<compile_context>
chip_gen: v7x
topology: tpu7x:2x2x1
jax: 0.10.0
libtpu: 0.0.40
codegen_flags: <defaults>
</compile_context>

<pallas_src>
import functools

import jax
import jax.numpy as jnp
from jax.experimental import pallas as pl
from jax.experimental.pallas import tpu as pltpu


def _cayley_kernel(x_ref, o_ref, *, n):
    """In-place Gauss-Jordan inversion of (I - X) in the output block, then
    o = 2*(I - X)^{-1} - I == (I - X)^{-1} (I + X)."""
    P, Q = x_ref.shape

    # (P,1)/(1,Q) iotas; eye built by a broadcast compare (no full (P,Q) int32
    # iota matrices are materialized).
    row_ids = jax.lax.broadcasted_iota(jnp.int32, (P, 1), 0)   # (P, 1)
    lane_ids = jax.lax.broadcasted_iota(jnp.int32, (1, Q), 1)  # (1, Q)
    eye = (row_ids == lane_ids).astype(jnp.float32)            # (P, Q)

    # Workspace is the output block itself: A = I - X (padded block-diagonal).
    o_ref[...] = eye - x_ref[...]

    def step(k, carry):
        A = o_ref[...]                                   # (P, Q) full tile load
        rowA = o_ref[pl.ds(k, 1), :]                     # (1, Q) pivot row (dyn sublane)

        lane_is_k = lane_ids == k                        # (1, Q)
        row_is_k = row_ids == k                          # (P, 1)

        # Pivot = A[k, k]: O(Q) lane reduce of the already-loaded pivot row.
        pivot = jnp.sum(jnp.where(lane_is_k, rowA, 0.0),
                        axis=1, keepdims=True)           # (1, 1)

        # EUP reciprocal + two Newton refinements (scalar-cheap, ~f32 exact).
        inv_p = pl.reciprocal(pivot, approx=True)
        inv_p = inv_p * (2.0 - pivot * inv_p)
        inv_p = inv_p * (2.0 - pivot * inv_p)

        rowA_n = rowA * inv_p                            # (1, Q) normalized pivot row

        # Column k of A via masked lane reduce (idle XLU; no serial MXU matvec).
        colA = jnp.sum(jnp.where(lane_is_k, A, 0.0),
                       axis=1, keepdims=True)            # (P, 1)

        # Fold the pivot-row normalization into the rank-1 update:
        # row k's factor becomes (pivot - 1) so the update yields rowA / pivot.
        factor = colA - row_is_k.astype(jnp.float32)     # (P, 1)
        updated = A - factor * rowA_n                    # rank-1 update (VPU)

        # In-place inversion: column k holds the multipliers
        #   1/p at row k, -A[i,k]/p elsewhere.
        new_col_k = jnp.where(row_is_k, inv_p, -colA * inv_p)   # (P, 1)

        # Exactly one full lane-dense (unmasked) tile store per step.
        o_ref[...] = jnp.where(lane_is_k, new_col_k, updated)
        return carry

    jax.lax.fori_loop(0, n, step, 0, unroll=(n <= 16))

    # (I - X)^{-1}(I + X) == 2 * (I - X)^{-1} - I.
    o_ref[...] = 2.0 * o_ref[...] - eye


def cayley_map(X):
    """Pallas equivalent of CayleyMap(n).forward(X): solve(I - X, I + X).

    Accepts a single (n, n) matrix or a batch (..., n, n); each matrix is one
    grid step on a leading "parallel" axis (both TensorCores on v7x)."""
    X = jnp.asarray(X)
    squeeze = X.ndim == 2
    Xb = X[None] if squeeze else X.reshape((-1,) + X.shape[-2:])
    B, n, n2 = Xb.shape
    assert n == n2, "CayleyMap expects square matrices"

    # Pad each matrix to a lane-dense (8, 128)-aligned tile.  Zero padding
    # keeps (I - Xp) block-diagonal, so the top-left (n, n) block of the
    # padded result equals the unpadded Cayley map exactly.
    P = ((n + 7) // 8) * 8
    Q = ((n + 127) // 128) * 128
    x_pad = jnp.zeros((B, P, Q), jnp.float32).at[:, :n, :n].set(
        Xb.astype(jnp.float32))

    # VMEM footprint: 1 input + 1 output/workspace block, double-buffered
    # across grid steps.  Capped at 48 MiB so it stays valid on v7x (64 MiB
    # per-TC VMEM) as well as v5e/v6e.
    vmem_limit = int(min(48 * 2**20, max(16 * 2**20, 4 * P * Q * 4 + (2 << 20))))

    out_pad = pl.pallas_call(
        functools.partial(_cayley_kernel, n=n),
        out_shape=jax.ShapeDtypeStruct((B, P, Q), jnp.float32),
        grid=(B,),
        in_specs=[pl.BlockSpec((None, P, Q), lambda b: (b, 0, 0))],
        out_specs=pl.BlockSpec((None, P, Q), lambda b: (b, 0, 0)),
        compiler_params=pltpu.CompilerParams(
            dimension_semantics=("parallel",),
            vmem_limit_bytes=vmem_limit),
    )(x_pad)

    out = out_pad[:, :n, :n].astype(X.dtype)
    return out[0] if squeeze else out.reshape(X.shape)


if __name__ == "__main__":
    # Mirrors: layer = nn.Linear(3, 3); X = torch.rand_like(layer.weight).
    # The self-test uses the intended parametrization regime (skew-symmetric
    # X => diag(I - X) == 1), where unpivoted Gauss-Jordan is numerically safe.
    n = 3
    key = jax.random.PRNGKey(0)
    U = jax.random.uniform(key, (n, n), dtype=jnp.float32)   # uniform [0, 1)
    X = 0.5 * (U - U.T)                                      # skew-symmetric

    out = cayley_map(X)
    jax.block_until_ready(out)

    I = jnp.eye(n, dtype=jnp.float32)
    ref = jnp.linalg.solve(I - X, I + X)
    assert out.shape == (n, n) and out.dtype == jnp.float32
    assert jnp.allclose(out, ref, atol=1e-4, rtol=1e-4), (out, ref)

    # Batched path (leading "parallel" grid axis).
    Ub = jax.random.uniform(jax.random.PRNGKey(1), (2, n, n), dtype=jnp.float32)
    Xb = 0.5 * (Ub - jnp.swapaxes(Ub, -1, -2))
    outb = cayley_map(Xb)
    jax.block_until_ready(outb)
    refb = jnp.linalg.solve(I - Xb, jnp.broadcast_to(I, Xb.shape) + Xb)
    assert outb.shape == (2, n, n)
    assert jnp.allclose(outb, refb, atol=1e-4, rtol=1e-4), (outb, refb)

    print("KERNEL_OK")
</pallas_src>

<mosaic_0001>
module attributes {stable_mosaic.version = 11 : i64} {
  func.func @_cayley_kernel(%arg0: i32, %arg1: memref<1x8x128xf32, #tpu.memory_space<vmem>>, %arg2: memref<1x8x128xf32, #tpu.memory_space<vmem>>) attributes {dimension_semantics = [#tpu.dimension_semantics<parallel>], iteration_bounds = array<i64: 1>, scalar_prefetch = 0 : i64, scratch_operands = 0 : i64, tpu.core_type = #tpu.core_type<tc>, window_params = [{transform_indices = @transform_0, window_bounds = array<i64: 1, 8, 128>}, {transform_indices = @transform_1, window_bounds = array<i64: 1, 8, 128>}]} {
    %0 = tpu.iota {dimensions = array<i32: 0>} : vector<8x1xi32>
    %1 = tpu.iota {dimensions = array<i32: 1>} : vector<1x128xi32>
    %2 = vector.broadcast %0 : vector<8x1xi32> to vector<8x128xi32>
    %3 = vector.broadcast %1 : vector<1x128xi32> to vector<8x128xi32>
    %4 = arith.cmpi eq, %2, %3 : vector<8x128xi32>
    %5 = arith.extui %4 : vector<8x128xi1> to vector<8x128xi32>
    %6 = arith.sitofp %5 : vector<8x128xi32> to vector<8x128xf32>
    %c0 = arith.constant 0 : index
    %c0_0 = arith.constant 0 : index
    %c0_1 = arith.constant 0 : index
    %7 = vector.load %arg1[%c0, %c0_0, %c0_1] : memref<1x8x128xf32, #tpu.memory_space<vmem>>, vector<1x8x128xf32>
    %8 = vector.shape_cast %7 : vector<1x8x128xf32> to vector<8x128xf32>
    %9 = arith.subf %6, %8 : vector<8x128xf32>
    %c0_2 = arith.constant 0 : index
    %c0_3 = arith.constant 0 : index
    %c0_4 = arith.constant 0 : index
    %10 = vector.load %arg2[%c0_2, %c0_3, %c0_4] : memref<1x8x128xf32, #tpu.memory_space<vmem>>, vector<1x8x128xf32>
    %11 = vector.shape_cast %10 : vector<1x8x128xf32> to vector<8x128xf32>
    %12 = vector.shape_cast %9 : vector<8x128xf32> to vector<1x8x128xf32>
    tpu.vector_store %arg2[%c0_2, %c0_3, %c0_4], %12 {strides = array<i32>} : memref<1x8x128xf32, #tpu.memory_space<vmem>>, vector<1x8x128xf32>,
    %c0_i32 = arith.constant 0 : i32
    %c0_5 = arith.constant 0 : index
    %c0_6 = arith.constant 0 : index
    %c0_7 = arith.constant 0 : index
    %13 = vector.load %arg2[%c0_5, %c0_6, %c0_7] : memref<1x8x128xf32, #tpu.memory_space<vmem>>, vector<1x8x128xf32>
    %14 = vector.shape_cast %13 : vector<1x8x128xf32> to vector<8x128xf32>
    %c0_8 = arith.constant 0 : index
    %15 = arith.index_cast %c0_i32 : i32 to index
    %c0_9 = arith.constant 0 : index
    %16 = vector.load %arg2[%c0_8, %15, %c0_9] : memref<1x8x128xf32, #tpu.memory_space<vmem>>, vector<1x1x128xf32>
    %17 = vector.shape_cast %16 : vector<1x1x128xf32> to vector<1x128xf32>
    %18 = vector.broadcast %c0_i32 : i32 to vector<1x128xi32>
    %19 = arith.cmpi eq, %1, %18 : vector<1x128xi32>
    %20 = vector.broadcast %c0_i32 : i32 to vector<8x1xi32>
    %21 = arith.cmpi eq, %0, %20 : vector<8x1xi32>
    %cst = arith.constant 0.000000e+00 : f32
    %22 = vector.broadcast %cst : f32 to vector<1x128xf32>
    %23 = arith.select %19, %17, %22 : vector<1x128xi1>, vector<1x128xf32>
    %cst_10 = arith.constant dense<0.000000e+00> : vector<1xf32>
    %24 = vector.multi_reduction <add>, %23, %cst_10 [1] : vector<1x128xf32> to vector<1xf32>
    %25 = vector.shape_cast %24 : vector<1xf32> to vector<1x1xf32>
    %26 = tpu.reciprocal %25 {approx = true} : vector<1x1xf32> -> vector<1x1xf32>
    %27 = arith.mulf %25, %26 : vector<1x1xf32>
    %cst_11 = arith.constant 2.000000e+00 : f32
    %28 = vector.broadcast %cst_11 : f32 to vector<1x1xf32>
    %29 = arith.subf %28, %27 : vector<1x1xf32>
    %30 = arith.mulf %26, %29 : vector<1x1xf32>
    %31 = arith.mulf %25, %30 : vector<1x1xf32>
    %cst_12 = arith.constant 2.000000e+00 : f32
    %32 = vector.broadcast %cst_12 : f32 to vector<1x1xf32>
    %33 = arith.subf %32, %31 : vector<1x1xf32>
    %34 = arith.mulf %30, %33 : vector<1x1xf32>
    %35 = vector.broadcast %34 : vector<1x1xf32> to vector<1x128xf32>
    %36 = arith.mulf %17, %35 : vector<1x128xf32>
    %cst_13 = arith.constant 0.000000e+00 : f32
    %37 = vector.shape_cast %19 : vector<1x128xi1> to vector<1x128xi1>
    %38 = vector.broadcast %37 : vector<1x128xi1> to vector<8x128xi1>
    %39 = vector.broadcast %cst_13 : f32 to vector<8x128xf32>
    %40 = arith.select %38, %14, %39 : vector<8x128xi1>, vector<8x128xf32>
    %cst_14 = arith.constant dense<0.000000e+00> : vector<8xf32>
    %41 = vector.multi_reduction <add>, %40, %cst_14 [1] : vector<8x128xf32> to vector<8xf32>
    %42 = vector.shape_cast %41 : vector<8xf32> to vector<8x1xf32>
    %43 = arith.extui %21 : vector<8x1xi1> to vector<8x1xi32>
    %44 = arith.sitofp %43 : vector<8x1xi32> to vector<8x1xf32>
    %45 = arith.subf %42, %44 : vector<8x1xf32>
    %46 = vector.broadcast %45 : vector<8x1xf32> to vector<8x128xf32>
    %47 = vector.broadcast %36 : vector<1x128xf32> to vector<8x128xf32>
    %48 = arith.mulf %46, %47 : vector<8x128xf32>
    %49 = arith.subf %14, %48 : vector<8x128xf32>
    %cst_15 = arith.constant 0.000000e+00 : f32
    %50 = vector.broadcast %cst_15 : f32 to vector<8x1xf32>
    %51 = arith.subf %50, %42 : vector<8x1xf32>
    %52 = vector.broadcast %34 : vector<1x1xf32> to vector<8x1xf32>
    %53 = arith.mulf %51, %52 : vector<8x1xf32>
    %54 = vector.shape_cast %34 : vector<1x1xf32> to vector<1x1xf32>
    %55 = vector.broadcast %54 : vector<1x1xf32> to vector<8x1xf32>
    %56 = arith.select %21, %55, %53 : vector<8x1xi1>, vector<8x1xf32>
    %57 = vector.shape_cast %19 : vector<1x128xi1> to vector<1x128xi1>
    %58 = vector.broadcast %57 : vector<1x128xi1> to vector<8x128xi1>
    %59 = vector.shape_cast %56 : vector<8x1xf32> to vector<8x1xf32>
    %60 = vector.broadcast %59 : vector<8x1xf32> to vector<8x128xf32>
    %61 = arith.select %58, %60, %49 : vector<8x128xi1>, vector<8x128xf32>
    %c0_16 = arith.constant 0 : index
    %c0_17 = arith.constant 0 : index
    %c0_18 = arith.constant 0 : index
    %62 = vector.load %arg2[%c0_16, %c0_17, %c0_18] : memref<1x8x128xf32, #tpu.memory_space<vmem>>, vector<1x8x128xf32>
    %63 = vector.shape_cast %62 : vector<1x8x128xf32> to vector<8x128xf32>
    %64 = vector.shape_cast %61 : vector<8x128xf32> to vector<1x8x128xf32>
    tpu.vector_store %arg2[%c0_16, %c0_17, %c0_18], %64 {strides = array<i32>} : memref<1x8x128xf32, #tpu.memory_space<vmem>>, vector<1x8x128xf32>,
    %c1_i32 = arith.constant 1 : i32
    %c0_19 = arith.constant 0 : index
    %c0_20 = arith.constant 0 : index
    %c0_21 = arith.constant 0 : index
    %65 = vector.load %arg2[%c0_19, %c0_20, %c0_21] : memref<1x8x128xf32, #tpu.memory_space<vmem>>, vector<1x8x128xf32>
    %66 = vector.shape_cast %65 : vector<1x8x128xf32> to vector<8x128xf32>
    %c0_22 = arith.constant 0 : index
    %67 = arith.index_cast %c1_i32 : i32 to index
    %c0_23 = arith.constant 0 : index
    %68 = vector.load %arg2[%c0_22, %67, %c0_23] : memref<1x8x128xf32, #tpu.memory_space<vmem>>, vector<1x1x128xf32>
    %69 = vector.shape_cast %68 : vector<1x1x128xf32> to vector<1x128xf32>
    %70 = vector.broadcast %c1_i32 : i32 to vector<1x128xi32>
    %71 = arith.cmpi eq, %1, %70 : vector<1x128xi32>
    %72 = vector.broadcast %c1_i32 : i32 to vector<8x1xi32>
    %73 = arith.cmpi eq, %0, %72 : vector<8x1xi32>
    %cst_24 = arith.constant 0.000000e+00 : f32
    %74 = vector.broadcast %cst_24 : f32 to vector<1x128xf32>
    %75 = arith.select %71, %69, %74 : vector<1x128xi1>, vector<1x128xf32>
    %cst_25 = arith.constant dense<0.000000e+00> : vector<1xf32>
    %76 = vector.multi_reduction <add>, %75, %cst_25 [1] : vector<1x128xf32> to vector<1xf32>
    %77 = vector.shape_cast %76 : vector<1xf32> to vector<1x1xf32>
    %78 = tpu.reciprocal %77 {approx = true} : vector<1x1xf32> -> vector<1x1xf32>
    %79 = arith.mulf %77, %78 : vector<1x1xf32>
    %cst_26 = arith.constant 2.000000e+00 : f32
    %80 = vector.broadcast %cst_26 : f32 to vector<1x1xf32>
    %81 = arith.subf %80, %79 : vector<1x1xf32>
    %82 = arith.mulf %78, %81 : vector<1x1xf32>
    %83 = arith.mulf %77, %82 : vector<1x1xf32>
    %cst_27 = arith.constant 2.000000e+00 : f32
    %84 = vector.broadcast %cst_27 : f32 to vector<1x1xf32>
    %85 = arith.subf %84, %83 : vector<1x1xf32>
    %86 = arith.mulf %82, %85 : vector<1x1xf32>
    %87 = vector.broadcast %86 : vector<1x1xf32> to vector<1x128xf32>
    %88 = arith.mulf %69, %87 : vector<1x128xf32>
    %cst_28 = arith.constant 0.000000e+00 : f32
    %89 = vector.shape_cast %71 : vector<1x128xi1> to vector<1x128xi1>
    %90 = vector.broadcast %89 : vector<1x128xi1> to vector<8x128xi1>
    %91 = vector.broadcast %cst_28 : f32 to vector<8x128xf32>
    %92 = arith.select %90, %66, %91 : vector<8x128xi1>, vector<8x128xf32>
    %cst_29 = arith.constant dense<0.000000e+00> : vector<8xf32>
    %93 = vector.multi_reduction <add>, %92, %cst_29 [1] : vector<8x128xf32> to vector<8xf32>
    %94 = vector.shape_cast %93 : vector<8xf32> to vector<8x1xf32>
    %95 = arith.extui %73 : vector<8x1xi1> to vector<8x1xi32>
    %96 = arith.sitofp %95 : vector<8x1xi32> to vector<8x1xf32>
    %97 = arith.subf %94, %96 : vector<8x1xf32>
    %98 = vector.broadcast %97 : vector<8x1xf32> to vector<8x128xf32>
    %99 = vector.broadcast %88 : vector<1x128xf32> to vector<8x128xf32>
    %100 = arith.mulf %98, %99 : vector<8x128xf32>
    %101 = arith.subf %66, %100 : vector<8x128xf32>
    %cst_30 = arith.constant 0.000000e+00 : f32
    %102 = vector.broadcast %cst_30 : f32 to vector<8x1xf32>
    %103 = arith.subf %102, %94 : vector<8x1xf32>
    %104 = vector.broadcast %86 : vector<1x1xf32> to vector<8x1xf32>
    %105 = arith.mulf %103, %104 : vector<8x1xf32>
    %106 = vector.shape_cast %86 : vector<1x1xf32> to vector<1x1xf32>
    %107 = vector.broadcast %106 : vector<1x1xf32> to vector<8x1xf32>
    %108 = arith.select %73, %107, %105 : vector<8x1xi1>, vector<8x1xf32>
    %109 = vector.shape_cast %71 : vector<1x128xi1> to vector<1x128xi1>
    %110 = vector.broadcast %109 : vector<1x128xi1> to vector<8x128xi1>
    %111 = vector.shape_cast %108 : vector<8x1xf32> to vector<8x1xf32>
    %112 = vector.broadcast %111 : vector<8x1xf32> to vector<8x128xf32>
    %113 = arith.select %110, %112, %101 : vector<8x128xi1>, vector<8x128xf32>
    %c0_31 = arith.constant 0 : index
    %c0_32 = arith.constant 0 : index
    %c0_33 = arith.constant 0 : index
    %114 = vector.load %arg2[%c0_31, %c0_32, %c0_33] : memref<1x8x128xf32, #tpu.memory_space<vmem>>, vector<1x8x128xf32>
    %115 = vector.shape_cast %114 : vector<1x8x128xf32> to vector<8x128xf32>
    %116 = vector.shape_cast %113 : vector<8x128xf32> to vector<1x8x128xf32>
    tpu.vector_store %arg2[%c0_31, %c0_32, %c0_33], %116 {strides = array<i32>} : memref<1x8x128xf32, #tpu.memory_space<vmem>>, vector<1x8x128xf32>,
    %c2_i32 = arith.constant 2 : i32
    %c0_34 = arith.constant 0 : index
    %c0_35 = arith.constant 0 : index
    %c0_36 = arith.constant 0 : index
    %117 = vector.load %arg2[%c0_34, %c0_35, %c0_36] : memref<1x8x128xf32, #tpu.memory_space<vmem>>, vector<1x8x128xf32>
    %118 = vector.shape_cast %117 : vector<1x8x128xf32> to vector<8x128xf32>
    %c0_37 = arith.constant 0 : index
    %119 = arith.index_cast %c2_i32 : i32 to index
    %c0_38 = arith.constant 0 : index
    %120 = vector.load %arg2[%c0_37, %119, %c0_38] : memref<1x8x128xf32, #tpu.memory_space<vmem>>, vector<1x1x128xf32>
    %121 = vector.shape_cast %120 : vector<1x1x128xf32> to vector<1x128xf32>
    %122 = vector.broadcast %c2_i32 : i32 to vector<1x128xi32>
    %123 = arith.cmpi eq, %1, %122 : vector<1x128xi32>
    %124 = vector.broadcast %c2_i32 : i32 to vector<8x1xi32>
    %125 = arith.cmpi eq, %0, %124 : vector<8x1xi32>
    %cst_39 = arith.constant 0.000000e+00 : f32
    %126 = vector.broadcast %cst_39 : f32 to vector<1x128xf32>
    %127 = arith.select %123, %121, %126 : vector<1x128xi1>, vector<1x128xf32>
    %cst_40 = arith.constant dense<0.000000e+00> : vector<1xf32>
    %128 = vector.multi_reduction <add>, %127, %cst_40 [1] : vector<1x128xf32> to vector<1xf32>
    %129 = vector.shape_cast %128 : vector<1xf32> to vector<1x1xf32>
    %130 = tpu.reciprocal %129 {approx = true} : vector<1x1xf32> -> vector<1x1xf32>
    %131 = arith.mulf %129, %130 : vector<1x1xf32>
    %cst_41 = arith.constant 2.000000e+00 : f32
    %132 = vector.broadcast %cst_41 : f32 to vector<1x1xf32>
    %133 = arith.subf %132, %131 : vector<1x1xf32>
    %134 = arith.mulf %130, %133 : vector<1x1xf32>
    %135 = arith.mulf %129, %134 : vector<1x1xf32>
    %cst_42 = arith.constant 2.000000e+00 : f32
    %136 = vector.broadcast %cst_42 : f32 to vector<1x1xf32>
    %137 = arith.subf %136, %135 : vector<1x1xf32>
    %138 = arith.mulf %134, %137 : vector<1x1xf32>
    %139 = vector.broadcast %138 : vector<1x1xf32> to vector<1x128xf32>
    %140 = arith.mulf %121, %139 : vector<1x128xf32>
    %cst_43 = arith.constant 0.000000e+00 : f32
    %141 = vector.shape_cast %123 : vector<1x128xi1> to vector<1x128xi1>
    %142 = vector.broadcast %141 : vector<1x128xi1> to vector<8x128xi1>
    %143 = vector.broadcast %cst_43 : f32 to vector<8x128xf32>
    %144 = arith.select %142, %118, %143 : vector<8x128xi1>, vector<8x128xf32>
    %cst_44 = arith.constant dense<0.000000e+00> : vector<8xf32>
    %145 = vector.multi_reduction <add>, %144, %cst_44 [1] : vector<8x128xf32> to vector<8xf32>
    %146 = vector.shape_cast %145 : vector<8xf32> to vector<8x1xf32>
    %147 = arith.extui %125 : vector<8x1xi1> to vector<8x1xi32>
    %148 = arith.sitofp %147 : vector<8x1xi32> to vector<8x1xf32>
    %149 = arith.subf %146, %148 : vector<8x1xf32>
    %150 = vector.broadcast %149 : vector<8x1xf32> to vector<8x128xf32>
    %151 = vector.broadcast %140 : vector<1x128xf32> to vector<8x128xf32>
    %152 = arith.mulf %150, %151 : vector<8x128xf32>
    %153 = arith.subf %118, %152 : vector<8x128xf32>
    %cst_45 = arith.constant 0.000000e+00 : f32
    %154 = vector.broadcast %cst_45 : f32 to vector<8x1xf32>
    %155 = arith.subf %154, %146 : vector<8x1xf32>
    %156 = vector.broadcast %138 : vector<1x1xf32> to vector<8x1xf32>
    %157 = arith.mulf %155, %156 : vector<8x1xf32>
    %158 = vector.shape_cast %138 : vector<1x1xf32> to vector<1x1xf32>
    %159 = vector.broadcast %158 : vector<1x1xf32> to vector<8x1xf32>
    %160 = arith.select %125, %159, %157 : vector<8x1xi1>, vector<8x1xf32>
    %161 = vector.shape_cast %123 : vector<1x128xi1> to vector<1x128xi1>
    %162 = vector.broadcast %161 : vector<1x128xi1> to vector<8x128xi1>
    %163 = vector.shape_cast %160 : vector<8x1xf32> to vector<8x1xf32>
    %164 = vector.broadcast %163 : vector<8x1xf32> to vector<8x128xf32>
    %165 = arith.select %162, %164, %153 : vector<8x128xi1>, vector<8x128xf32>
    %c0_46 = arith.constant 0 : index
    %c0_47 = arith.constant 0 : index
    %c0_48 = arith.constant 0 : index
    %166 = vector.load %arg2[%c0_46, %c0_47, %c0_48] : memref<1x8x128xf32, #tpu.memory_space<vmem>>, vector<1x8x128xf32>
    %167 = vector.shape_cast %166 : vector<1x8x128xf32> to vector<8x128xf32>
    %168 = vector.shape_cast %165 : vector<8x128xf32> to vector<1x8x128xf32>
    tpu.vector_store %arg2[%c0_46, %c0_47, %c0_48], %168 {strides = array<i32>} : memref<1x8x128xf32, #tpu.memory_space<vmem>>, vector<1x8x128xf32>,
    %c3_i32 = arith.constant 3 : i32
    %c0_49 = arith.constant 0 : index
    %c0_50 = arith.constant 0 : index
    %c0_51 = arith.constant 0 : index
    %169 = vector.load %arg2[%c0_49, %c0_50, %c0_51] : memref<1x8x128xf32, #tpu.memory_space<vmem>>, vector<1x8x128xf32>
    %170 = vector.shape_cast %169 : vector<1x8x128xf32> to vector<8x128xf32>
    %cst_52 = arith.constant 2.000000e+00 : f32
    %171 = vector.broadcast %cst_52 : f32 to vector<8x128xf32>
    %172 = arith.mulf %171, %170 : vector<8x128xf32>
    %173 = arith.subf %172, %6 : vector<8x128xf32>
    %c0_53 = arith.constant 0 : index
    %c0_54 = arith.constant 0 : index
    %c0_55 = arith.constant 0 : index
    %174 = vector.load %arg2[%c0_53, %c0_54, %c0_55] : memref<1x8x128xf32, #tpu.memory_space<vmem>>, vector<1x8x128xf32>
    %175 = vector.shape_cast %174 : vector<1x8x128xf32> to vector<8x128xf32>
    %176 = vector.shape_cast %173 : vector<8x128xf32> to vector<1x8x128xf32>
    tpu.vector_store %arg2[%c0_53, %c0_54, %c0_55], %176 {strides = array<i32>} : memref<1x8x128xf32, #tpu.memory_space<vmem>>, vector<1x8x128xf32>,
    return
  }
  func.func @transform_0(%arg0: i32) -> (i32, i32, i32) {
    %c0_i32 = arith.constant 0 : i32
    %c0_i32_0 = arith.constant 0 : i32
    %c0_i32_1 = arith.constant 0 : i32
    return %arg0, %c0_i32, %c0_i32_0 : i32, i32, i32
  }
  func.func @transform_1(%arg0: i32) -> (i32, i32, i32) {
    %c0_i32 = arith.constant 0 : i32
    %c0_i32_0 = arith.constant 0 : i32
    %c0_i32_1 = arith.constant 0 : i32
    return %arg0, %c0_i32, %c0_i32_0 : i32, i32, i32
  }
}

</mosaic_0001>

<bundles_post_ra>
// kernel: tpu_custom_call.1
= control target key start
LH: loop header
LB: loop body
LE: loop exit
PB: predicated region body
PF: predicated region fallthrough
CT: control target
= control target key end

     0   :  { %6 = vsyncpa [#allocation3], 0  ;;  %s316_s0 = inlined_call_operand.hbm [shape: f32[1,8,128], index: 0, kind: input, shape index: {}]   ;;  %s317_s1 = inlined_call_operand.hbm [shape: f32[1,8,128], index: 1, kind: output, shape index: {}]  }
   0x1   :  { %7 = vsyncpa [#allocation4], 0  ;;  %s229_s6 = smov [#allocation2]   ;;  %s181_s10 = scalar_lea.hbm %s316_s0, 128 }
   0x2   :  { %s14_s7 = sshll.u32 %s229_s6, 4  ;;  %p182_p0 = scmp.ne.s32.totalorder %s316_s0, %s181_s10  ;;  %s15_s7 = int_to_ptr.vmem [resolvable:$true] %s14_s7 }
   0x3   :  { %p185_p1 = scmp.lt.u32.totalorder %s181_s10, %s316_s0 }
   0x5   :  { %p187_p2 = pnand %p185_p1, %p182_p0 }
   0x7   :  { %190 = shalt.err (!%p187_p2)
}
   0x8   :  { %s191_s15 = scalar_lea.vmem %s15_s7, 128  ;;  %p196_p4 = scmp.lt.s32.totalorder %s15_s7, %s15_s7 }
   0x9   :  { %p192_p3 = scmp.ne.s32.totalorder %s15_s7, %s191_s15  ;;  %p197_p5 = scmp.lt.s32.totalorder %s191_s15, %s191_s15 }
   0xb   :  { %p198_p6 = por %p197_p5, %p196_p4 }
   0xd   :  { %p199_p7 = pnand %p198_p6, %p192_p3 }
   0xf   :  { %202 = shalt.err (!%p199_p7)
}
  0x10   :  { %17 = dma.hbm_to_vmem [thread:$0]  %s316_s0, 128, %s15_s7, [#allocation3]  }
  0x11   :  { %225 = dma.done.wait [#allocation3], 128  }
  0x12   :  { %226 = vsyncadd [#allocation3], 4294967168  ;;  %v21_v0 = vlaneseq  ;;  %v230_v3 = vmov 0.0   ;;  %v28_v5 = vld [vmem:[#allocation2] sm:$0xff]  ;;  %vm36_vm2 = vcmask 1040384   ;;  %s231_s0 = smov [#allocation5]  }
  0x13   :  { %s159_s18 = sshll.u32 %s231_s0, 4  ;;  %s160_s18 = int_to_ptr.vmem [resolvable:$true] %s159_s18 }
  0x14   :  { %v254_v1 = vshrl.u32 %v21_v0, 7  ;;  %v256_v2 = vand.u32 127, %v21_v0  ;;  %s203_s19 = scalar_lea.vmem %s160_s18, 128  ;;  %p208_p9 = scmp.lt.s32.totalorder %s160_s18, %s160_s18 }
  0x15   :  { %p204_p8 = scmp.ne.s32.totalorder %s160_s18, %s203_s19  ;;  %p209_p10 = scmp.lt.s32.totalorder %s203_s19, %s203_s19 }
  0x16   :  { %vm25_vm0 = vcmp.eq.s32.totalorder %v254_v1, %v256_v2  ;;  %vm33_vm1 = vcmp.eq.s32.totalorder %v256_v2, 0  ;;  %vm34_vm3 = vcmp.eq.s32.totalorder %v254_v1, 0  ;;  %v272_v18 = vsub.s32 0, %v254_v1 }
  0x17   :  { %v261_v4 = vsel %vm25_vm0, 1.0, %v230_v3  ;;  %v169_v20 = vsel %vm34_vm3, 1.0, %v230_v3  ;;  %vm73_vm4 = vcmp.eq.s32.totalorder %v256_v2, 1  ;;  %vm74_vm5 = vcmp.eq.s32.totalorder %v254_v1, 1  ;;  %p210_p11 = por %p209_p10, %p208_p9 }
  0x18   :  { %v29_v6 = vsub.f32 %v261_v4, %v28_v5  ;;  %v170_v45 = vsel %vm74_vm5, 1.0, %v230_v3  ;;  %vm112_vm6 = vcmp.eq.s32.totalorder %v256_v2, 2  ;;  %vm113_vm7 = vcmp.eq.s32.totalorder %v254_v1, 2 }
  0x19   :  { %p211_p12 = pnand %p210_p11, %p204_p8 }
  0x1a   :  { %30 = vst [vmem:[#allocation5] sm:$0xff] %v29_v6  ;;  %v50_v10 = vsel %vm33_vm1, %v29_v6, 0.0 }
  0x21   :  { %v32_v7 = vld [vmem:[#allocation5] sm:$0x1] }
  0x22   :  { %v35_v8 = vsel %vm33_vm1, %v32_v7, 0.0 }
  0x23   :  { %v37_v9 = vsel %vm36_vm2, %v35_v8, 0.0 }
  0x24   :  { %38 = vadd.xlane.f32.xlu0 %v37_v9  ;;  %v171_v9 = vsel %vm113_vm7, 1.0, %v230_v3 }
  0x28   :  { %51 = vadd.xlane.f32.xlu0 %v50_v10 }
  0xb1   :  { %v39_v11 = vpop.xlane.xlu0 %38 }
  0xb2   :  { %175 = vrcp.f32 %v39_v11 }
  0xb5   :  { %v52_v19 = vpop.xlane.xlu0 %51 }
  0xb6   :  { %v62_v22 = vsub.f32 0.0, %v52_v19  ;;  %v55_v25 = vsub.f32 %v52_v19, %v169_v20 }
  0xbc   :  { %v176_v12 = vpop.eup %175 }
  0xbd   :  { %v41_v13 = vmul.f32 %v176_v12, %v39_v11 }
  0xbf   :  { %v42_v14 = vsub.f32 2.0, %v41_v13 }
  0xc1   :  { %v43_v15 = vmul.f32 %v176_v12, %v42_v14 }
  0xc3   :  { %v44_v16 = vmul.f32 %v43_v15, %v39_v11 }
  0xc5   :  { %v45_v17 = vsub.f32 2.0, %v44_v16 }
  0xc7   :  { %v46_v21 = vmul.f32 %v45_v17, %v43_v15 }
  0xc9   :  { %v47_v23 = vmul.f32 %v46_v21, %v32_v7  ;;  %v66_v24 = vrot.slane %v46_v21, %v272_v18 }
  0xcb   :  { %v59_v26 = vrot.slane %v47_v23, %v272_v18  ;;  %v67_v27 = vmul.f32 %v66_v24, %v62_v22 }
  0xcd   :  { %v60_v28 = vmul.f32 %v59_v26, %v55_v25  ;;  %v68_v30 = vsel %vm34_vm3, %v66_v24, %v67_v27 }
  0xcf   :  { %v61_v29 = vsub.f32 %v29_v6, %v60_v28 }
  0xd1   :  { %v69_v31 = vsel %vm33_vm1, %v68_v30, %v61_v29 }
  0xd2   :  { %70 = vst [vmem:[#allocation5] sm:$0xff] %v69_v31  ;;  %v89_v35 = vsel %vm73_vm4, %v69_v31, 0.0 }
  0xd9   :  { %v72_v32 = vld [vmem:[#allocation5 + $0x1] sm:$0x1] }
  0xda   :  { %v75_v33 = vsel %vm73_vm4, %v72_v32, 0.0 }
  0xdb   :  { %v76_v34 = vsel %vm36_vm2, %v75_v33, 0.0 }
  0xdc   :  { %77 = vadd.xlane.f32.xlu1 %v76_v34 }
  0xe0   :  { %90 = vadd.xlane.f32.xlu1 %v89_v35 }
 0x169   :  { %v78_v36 = vpop.xlane.xlu1 %77 }
 0x16a   :  { %177 = vrcp.f32 %v78_v36 }
 0x16d   :  { %v91_v44 = vpop.xlane.xlu1 %90 }
 0x16e   :  { %v101_v48 = vsub.f32 0.0, %v91_v44  ;;  %v94_v50 = vsub.f32 %v91_v44, %v170_v45 }
 0x174   :  { %v178_v37 = vpop.eup %177 }
 0x175   :  { %v80_v38 = vmul.f32 %v178_v37, %v78_v36 }
 0x177   :  { %v81_v39 = vsub.f32 2.0, %v80_v38 }
 0x179   :  { %v82_v40 = vmul.f32 %v178_v37, %v81_v39 }
 0x17b   :  { %v83_v41 = vmul.f32 %v82_v40, %v78_v36 }
 0x17d   :  { %v84_v42 = vsub.f32 2.0, %v83_v41 }
 0x17f   :  { %v85_v43 = vmul.f32 %v84_v42, %v82_v40 }
 0x181   :  { %v86_v46 = vmul.f32 %v85_v43, %v72_v32  ;;  %v105_v47 = vrot.slane %v85_v43, %v272_v18 }
 0x183   :  { %v98_v49 = vrot.slane %v86_v46, %v272_v18  ;;  %v106_v51 = vmul.f32 %v105_v47, %v101_v48 }
 0x185   :  { %v99_v52 = vmul.f32 %v98_v49, %v94_v50  ;;  %v107_v54 = vsel %vm74_vm5, %v105_v47, %v106_v51 }
 0x187   :  { %v100_v53 = vsub.f32 %v69_v31, %v99_v52 }
 0x189   :  { %v108_v55 = vsel %vm73_vm4, %v107_v54, %v100_v53 }
 0x18a   :  { %109 = vst [vmem:[#allocation5] sm:$0xff] %v108_v55  ;;  %v128_v56 = vsel %vm112_vm6, %v108_v55, 0.0 }
 0x18b   :  { %129 = vadd.xlane.f32.xlu1 %v128_v56 }
 0x191   :  { %v111_v57 = vld [vmem:[#allocation5 + $0x2] sm:$0x1] }
 0x192   :  { %v114_v58 = vsel %vm112_vm6, %v111_v57, 0.0 }
 0x193   :  { %v115_v59 = vsel %vm36_vm2, %v114_v58, 0.0 }
 0x194   :  { %116 = vadd.xlane.f32.xlu0 %v115_v59 }
 0x218   :  { %v130_v7 = vpop.xlane.xlu1 %129 }
 0x219   :  { %v140_v12 = vsub.f32 0.0, %v130_v7  ;;  %v133_v13 = vsub.f32 %v130_v7, %v171_v9 }
 0x221   :  { %v117_v60 = vpop.xlane.xlu0 %116 }
 0x222   :  { %179 = vrcp.f32 %v117_v60 }
 0x22c   :  { %v180_v61 = vpop.eup %179 }
 0x22d   :  { %v119_v62 = vmul.f32 %v180_v61, %v117_v60 }
 0x22f   :  { %v120_v63 = vsub.f32 2.0, %v119_v62 }
 0x231   :  { %v121_v0 = vmul.f32 %v180_v61, %v120_v63 }
 0x233   :  { %v122_v5 = vmul.f32 %v121_v0, %v117_v60 }
 0x235   :  { %v123_v6 = vsub.f32 2.0, %v122_v5 }
 0x237   :  { %v124_v8 = vmul.f32 %v123_v6, %v121_v0 }
 0x239   :  { %v125_v10 = vmul.f32 %v124_v8, %v111_v57  ;;  %v144_v11 = vrot.slane %v124_v8, %v272_v18 }
 0x23b   :  { %v137_v14 = vrot.slane %v125_v10, %v272_v18  ;;  %v145_v15 = vmul.f32 %v144_v11, %v140_v12 }
 0x23d   :  { %v138_v16 = vmul.f32 %v137_v14, %v133_v13  ;;  %v146_v19 = vsel %vm113_vm7, %v144_v11, %v145_v15 }
 0x23f   :  { %v139_v17 = vsub.f32 %v108_v55, %v138_v16 }
 0x241   :  { %v147_v20 = vsel %vm112_vm6, %v146_v19, %v139_v17 }
 0x242   :  { %v150_v1 = vmul.f32 2.0, %v147_v20 }
 0x244   :  { %v151_v21 = vsub.f32 %v150_v1, %v261_v4 }
 0x246   :  { %152 = vst [vmem:[#allocation5] sm:$0xff] %v151_v21 }
 0x247   :  { %214 = shalt.err (!%p211_p12)
}
 0x248   :  { %s215_s22 = scalar_lea.hbm %s317_s1, 128 }
 0x249   :  { %p216_p13 = scmp.ne.s32.totalorder %s317_s1, %s215_s22  ;;  %p219_p0 = scmp.lt.u32.totalorder %s215_s22, %s317_s1 }
 0x24b   :  { %p221_p1 = pnand %p219_p0, %p216_p13 }
 0x24d   :  { %224 = shalt.err (!%p221_p1)
}
 0x24e   :  { %162 = dma.vmem_to_hbm [thread:$0]  %s160_s18, 128, %s317_s1, [#allocation4]  }
 0x24f   :  { %227 = dma.done.wait [#allocation4], 128  }
 0x250   :  { %228 = vsyncadd [#allocation4], 4294967168 }
 0x251   :  { %166 = vsyncpa [#allocation3], 1 }
 0x252   :  { %167 = vsyncpa [#allocation4], 1 }

</bundles_post_ra>
